<compile_context>
chip_gen: v7x
topology: tpu7x:2x2x1
jax: 0.10.0
libtpu: 0.0.40
codegen_flags: <defaults>
</compile_context>

<pallas_src>
import functools
import math

import jax
import jax.numpy as jnp
from jax.experimental import pallas as pl
from jax.experimental.pallas import tpu as pltpu


def _cdiv(a, b):
    return (a + b - 1) // b


def _round_up(v, m):
    return ((v + m - 1) // m) * m


def _layernorm_kernel(x_ref, a_ref, b_ref, o_ref, *, eps, inv_nm1):
    """Plain path: one logical row per slab row (features >= 128 or fallback)."""
    x = x_ref[...].astype(jnp.float32)                    # (T, F)
    mean = jnp.mean(x, axis=-1, keepdims=True)
    xc = x - mean
    var = jnp.sum(xc * xc, axis=-1, keepdims=True) * inv_nm1
    rstd = pl.reciprocal(jnp.sqrt(var) + eps, approx=False)
    a = a_ref[...].astype(jnp.float32)
    b = b_ref[...].astype(jnp.float32)
    o_ref[...] = (xc * rstd * a + b).astype(o_ref.dtype)


def _layernorm_packed_kernel(x_ref, a_ref, b_ref, o_ref, *, eps, inv_nm1, feat, k):
    """Lane-dense path: k logical rows packed along the lane axis of each slab
    row (features < 128).  Loads/stores/VPU ops stay at full 128-lane width;
    per-row statistics use k masked cross-lane reductions (statically unrolled,
    k <= 16)."""
    x = x_ref[...].astype(jnp.float32)                    # (T, k*feat)
    kf = x.shape[-1]
    lane = jax.lax.broadcasted_iota(jnp.int32, (1, kf), 1)
    inv_f = 1.0 / feat

    # Segmented mean: k masked sums, each scattered back to its F lanes.
    mean = jnp.zeros_like(x)
    for j in range(k):                                    # static unroll
        m = (lane >= j * feat) & (lane < (j + 1) * feat)  # (1, kf)
        s = jnp.sum(jnp.where(m, x, 0.0), axis=-1, keepdims=True)
        mean = jnp.where(m, s * inv_f, mean)

    xc = x - mean
    xsq = xc * xc

    # Segmented unbiased variance (two-pass, centered, for robustness).
    var = jnp.zeros_like(x)
    for j in range(k):
        m = (lane >= j * feat) & (lane < (j + 1) * feat)
        ss = jnp.sum(jnp.where(m, xsq, 0.0), axis=-1, keepdims=True)
        var = jnp.where(m, ss * inv_nm1, var)

    rstd = pl.reciprocal(jnp.sqrt(var) + eps, approx=False)
    a = a_ref[...].astype(jnp.float32)                    # (1, k*feat), pre-tiled
    b = b_ref[...].astype(jnp.float32)
    o_ref[...] = (xc * rstd * a + b).astype(o_ref.dtype)


def _choose_tiling(work_rows, bytes_per_row, sublane, eff_block_bytes):
    """Pick (tile_rows, grid_steps) for the row axis."""
    total_bytes = work_rows * bytes_per_row
    # Tiny slab: single full-extent block (pipeline overhead not worth it).
    if total_bytes <= (512 << 10) or work_rows <= 2 * sublane:
        return work_rows, 1

    # Bytes-budgeted tile (no fixed row cap), floored to sublane granularity.
    tile = max(sublane, (eff_block_bytes // bytes_per_row) // sublane * sublane)
    # Keep at least ~8 grid steps so HBM read / compute / writeback overlap and
    # rows spread across both v7x TensorCores.
    cap = max(sublane, (_cdiv(work_rows, 8) // sublane) * sublane)
    tile = min(tile, cap)
    steps = _cdiv(work_rows, tile)

    # Prefer an even step count so ("parallel",) splits evenly across 2 TCs.
    if steps > 1 and steps % 2 == 1:
        alt = max(sublane, _round_up(_cdiv(work_rows, steps + 1), sublane))
        if _cdiv(work_rows, alt) % 2 == 0:
            tile, steps = alt, _cdiv(work_rows, alt)
    return tile, steps


def layer_norm(x, a_2, b_2, eps=1e-6, *,
               target_block_bytes=4 << 20,     # ~4 MiB f32 blocks
               vmem_limit_bytes=48 << 20):     # fits v7x 64 MiB/TC with headroom
    """LayerNorm over the last axis of x (any leading dims)."""
    orig_shape = x.shape
    feat = orig_shape[-1]
    rows = 1
    for d in orig_shape[:-1]:
        rows *= d

    # torch.std is unbiased (N-1).  For feat == 1 this is 0/0 -> NaN at runtime
    # (matches torch.std); computed here so tracing never divides by zero.
    inv_nm1 = (1.0 / (feat - 1)) if feat > 1 else float("nan")

    # Lane-dense repack decision: fold k rows into the lanes so the slab's last
    # dim is a multiple of 128 (dense vld/vst, full VPU lane utilization).
    use_pack = False
    k = 1
    if 1 < feat < 128:
        k = 128 // math.gcd(feat, 128)        # smallest k with k*feat % 128 == 0
        if k <= 16 and rows % k == 0:
            use_pack = True
        else:
            k = 1
            # TODO(synk): pad rows to a multiple of k so ragged row counts /
            # very narrow features also get the lane-dense layout instead of
            # falling back to masked partial stores.

    if use_pack:
        work_rows, work_feat = rows // k, k * feat
        x2 = x.reshape(work_rows, work_feat)            # free contiguous reshape
        a2 = jnp.tile(a_2.reshape(1, feat), (1, k))     # (1, k*feat)
        b2 = jnp.tile(b_2.reshape(1, feat), (1, k))
        kernel = functools.partial(_layernorm_packed_kernel, eps=eps,
                                   inv_nm1=inv_nm1, feat=feat, k=k)
    else:
        work_rows, work_feat = rows, feat
        x2 = x.reshape(rows, feat)
        a2 = a_2.reshape(1, feat)
        b2 = b_2.reshape(1, feat)
        kernel = functools.partial(_layernorm_kernel, eps=eps, inv_nm1=inv_nm1)

    itemsize = jnp.dtype(x.dtype).itemsize
    # Sublane granularity: 8 rows for 4-byte dtypes, 16 for 2-byte, 32 for 1-byte.
    sublane = 8 * max(1, 4 // itemsize)
    bytes_per_row = max(work_feat * itemsize, 1)
    # Scale the HBM block budget by itemsize/4: in-kernel f32 temporaries are
    # 4/itemsize x the block bytes, which is what actually busts VMEM on v7x.
    eff_block_bytes = max(sublane * bytes_per_row, target_block_bytes * itemsize // 4)

    tile_rows, grid_steps = _choose_tiling(work_rows, bytes_per_row, sublane,
                                           eff_block_bytes)
    grid = (grid_steps,)

    cost = pl.CostEstimate(
        flops=10 * rows * feat,
        transcendentals=2 * rows,                        # sqrt + reciprocal per row
        bytes_accessed=(2 * rows * feat + 2 * feat) * itemsize,
    )

    out2 = pl.pallas_call(
        kernel,
        out_shape=jax.ShapeDtypeStruct((work_rows, work_feat), x.dtype),
        grid_spec=pltpu.PrefetchScalarGridSpec(
            num_scalar_prefetch=0,
            grid=grid,
            in_specs=[
                pl.BlockSpec((tile_rows, work_feat), lambda i: (i, 0)),
                pl.BlockSpec((1, work_feat), lambda i: (0, 0)),
                pl.BlockSpec((1, work_feat), lambda i: (0, 0)),
            ],
            out_specs=pl.BlockSpec((tile_rows, work_feat), lambda i: (i, 0)),
        ),
        compiler_params=pltpu.CompilerParams(
            dimension_semantics=("parallel",),   # shards row grid across TCs on v7x
            vmem_limit_bytes=vmem_limit_bytes,
        ),
        cost_estimate=cost,
    )(x2, a2, b2)

    return out2.reshape(orig_shape)


def layer_norm_ref(x, a_2, b_2, eps=1e-6):
    """Pure-JAX reference mirroring the PyTorch module."""
    xf = x.astype(jnp.float32)
    mean = jnp.mean(xf, axis=-1, keepdims=True)
    var = jnp.sum((xf - mean) ** 2, axis=-1, keepdims=True) / (xf.shape[-1] - 1)
    std = jnp.sqrt(var)
    return (a_2 * (xf - mean) / (std + eps) + b_2).astype(x.dtype)


if __name__ == "__main__":
    key = jax.random.PRNGKey(0)

    # Primary: module-implied shape (batch=2, seq=8, hidden=32) -> lane-packed
    # path (k=4 rows folded into 128 lanes), single block.
    batch, seq, hidden = 2, 8, 32
    x = jax.random.normal(key, (batch, seq, hidden), dtype=jnp.float32)
    a_2 = jnp.ones((hidden,), dtype=jnp.float32)     # nn.Parameter(torch.ones)
    b_2 = jnp.zeros((hidden,), dtype=jnp.float32)    # nn.Parameter(torch.zeros)
    out = jax.block_until_ready(layer_norm(x, a_2, b_2, eps=1e-6))
    ref = layer_norm_ref(x, a_2, b_2, eps=1e-6)
    assert out.shape == x.shape
    assert jnp.allclose(out, ref, atol=1e-5, rtol=1e-5), "primary mismatch"

    # Secondary: wide features (plain path), non-trivial affine params, rows not
    # divisible by the tile -> multi-step grid with a masked partial edge block.
    k1, k2, k3 = jax.random.split(jax.random.PRNGKey(0), 3)
    x2 = jax.random.normal(k1, (5, 205, 256), dtype=jnp.float32)
    a2p = jax.random.normal(k2, (256,), dtype=jnp.float32)
    b2p = jax.random.normal(k3, (256,), dtype=jnp.float32)
    out2 = jax.block_until_ready(
        layer_norm(x2, a2p, b2p, eps=1e-6, target_block_bytes=8 * 1024))
    ref2 = layer_norm_ref(x2, a2p, b2p, eps=1e-6)
    assert out2.shape == x2.shape
    assert jnp.allclose(out2, ref2, atol=1e-5, rtol=1e-5), "edge-block mismatch"

    # Tertiary: narrow features with enough rows to get a pipelined, even-length
    # grid through the lane-packed path (k=2, 8 grid steps).
    k4, k5, k6 = jax.random.split(jax.random.PRNGKey(1), 3)
    x3 = jax.random.normal(k4, (16, 256, 64), dtype=jnp.float32)
    a3 = jax.random.normal(k5, (64,), dtype=jnp.float32)
    b3 = jax.random.normal(k6, (64,), dtype=jnp.float32)
    out3 = jax.block_until_ready(layer_norm(x3, a3, b3, eps=1e-6))
    ref3 = layer_norm_ref(x3, a3, b3, eps=1e-6)
    assert out3.shape == x3.shape
    assert jnp.allclose(out3, ref3, atol=1e-5, rtol=1e-5), "packed-tiled mismatch"

    print("KERNEL_OK")
</pallas_src>

<mosaic_0001>
module attributes {stable_mosaic.version = 11 : i64} {
  func.func @_layernorm_packed_kernel(%arg0: i32, %arg1: memref<4x128xf32, #tpu.memory_space<vmem>>, %arg2: memref<1x128xf32, #tpu.memory_space<vmem>>, %arg3: memref<1x128xf32, #tpu.memory_space<vmem>>, %arg4: memref<4x128xf32, #tpu.memory_space<vmem>>) attributes {dimension_semantics = [#tpu.dimension_semantics<parallel>], iteration_bounds = array<i64: 1>, scalar_prefetch = 0 : i64, scratch_operands = 0 : i64, tpu.core_type = #tpu.core_type<tc>, window_params = [{transform_indices = @transform_0, window_bounds = array<i64: 4, 128>}, {pipeline_mode = #tpu.pipeline_mode<synchronous>, transform_indices = @transform_1, window_bounds = array<i64: 1, 128>}, {pipeline_mode = #tpu.pipeline_mode<synchronous>, transform_indices = @transform_2, window_bounds = array<i64: 1, 128>}, {transform_indices = @transform_3, window_bounds = array<i64: 4, 128>}]} {
    %c0 = arith.constant 0 : index
    %c0_0 = arith.constant 0 : index
    %0 = vector.load %arg1[%c0, %c0_0] : memref<4x128xf32, #tpu.memory_space<vmem>>, vector<4x128xf32>
    %1 = tpu.iota {dimensions = array<i32: 1>} : vector<1x128xi32>
    %cst = arith.constant 0.000000e+00 : f32
    %2 = vector.broadcast %cst : f32 to vector<4x128xf32>
    %c0_i32 = arith.constant 0 : i32
    %3 = vector.broadcast %c0_i32 : i32 to vector<1x128xi32>
    %4 = arith.cmpi sge, %1, %3 : vector<1x128xi32>
    %c32_i32 = arith.constant 32 : i32
    %5 = vector.broadcast %c32_i32 : i32 to vector<1x128xi32>
    %6 = arith.cmpi slt, %1, %5 : vector<1x128xi32>
    %7 = arith.andi %4, %6 : vector<1x128xi1>
    %cst_1 = arith.constant 0.000000e+00 : f32
    %8 = vector.shape_cast %7 : vector<1x128xi1> to vector<1x128xi1>
    %9 = vector.broadcast %8 : vector<1x128xi1> to vector<4x128xi1>
    %10 = vector.broadcast %cst_1 : f32 to vector<4x128xf32>
    %11 = arith.select %9, %0, %10 : vector<4x128xi1>, vector<4x128xf32>
    %cst_2 = arith.constant dense<0.000000e+00> : vector<4xf32>
    %12 = vector.multi_reduction <add>, %11, %cst_2 [1] : vector<4x128xf32> to vector<4xf32>
    %13 = vector.shape_cast %12 : vector<4xf32> to vector<4x1xf32>
    %cst_3 = arith.constant 3.125000e-02 : f32
    %14 = vector.broadcast %cst_3 : f32 to vector<4x1xf32>
    %15 = arith.mulf %13, %14 : vector<4x1xf32>
    %16 = vector.shape_cast %7 : vector<1x128xi1> to vector<1x128xi1>
    %17 = vector.broadcast %16 : vector<1x128xi1> to vector<4x128xi1>
    %18 = vector.shape_cast %15 : vector<4x1xf32> to vector<4x1xf32>
    %19 = vector.broadcast %18 : vector<4x1xf32> to vector<4x128xf32>
    %20 = arith.select %17, %19, %2 : vector<4x128xi1>, vector<4x128xf32>
    %c32_i32_4 = arith.constant 32 : i32
    %21 = vector.broadcast %c32_i32_4 : i32 to vector<1x128xi32>
    %22 = arith.cmpi sge, %1, %21 : vector<1x128xi32>
    %c64_i32 = arith.constant 64 : i32
    %23 = vector.broadcast %c64_i32 : i32 to vector<1x128xi32>
    %24 = arith.cmpi slt, %1, %23 : vector<1x128xi32>
    %25 = arith.andi %22, %24 : vector<1x128xi1>
    %cst_5 = arith.constant 0.000000e+00 : f32
    %26 = vector.shape_cast %25 : vector<1x128xi1> to vector<1x128xi1>
    %27 = vector.broadcast %26 : vector<1x128xi1> to vector<4x128xi1>
    %28 = vector.broadcast %cst_5 : f32 to vector<4x128xf32>
    %29 = arith.select %27, %0, %28 : vector<4x128xi1>, vector<4x128xf32>
    %cst_6 = arith.constant dense<0.000000e+00> : vector<4xf32>
    %30 = vector.multi_reduction <add>, %29, %cst_6 [1] : vector<4x128xf32> to vector<4xf32>
    %31 = vector.shape_cast %30 : vector<4xf32> to vector<4x1xf32>
    %cst_7 = arith.constant 3.125000e-02 : f32
    %32 = vector.broadcast %cst_7 : f32 to vector<4x1xf32>
    %33 = arith.mulf %31, %32 : vector<4x1xf32>
    %34 = vector.shape_cast %25 : vector<1x128xi1> to vector<1x128xi1>
    %35 = vector.broadcast %34 : vector<1x128xi1> to vector<4x128xi1>
    %36 = vector.shape_cast %33 : vector<4x1xf32> to vector<4x1xf32>
    %37 = vector.broadcast %36 : vector<4x1xf32> to vector<4x128xf32>
    %38 = arith.select %35, %37, %20 : vector<4x128xi1>, vector<4x128xf32>
    %c64_i32_8 = arith.constant 64 : i32
    %39 = vector.broadcast %c64_i32_8 : i32 to vector<1x128xi32>
    %40 = arith.cmpi sge, %1, %39 : vector<1x128xi32>
    %c96_i32 = arith.constant 96 : i32
    %41 = vector.broadcast %c96_i32 : i32 to vector<1x128xi32>
    %42 = arith.cmpi slt, %1, %41 : vector<1x128xi32>
    %43 = arith.andi %40, %42 : vector<1x128xi1>
    %cst_9 = arith.constant 0.000000e+00 : f32
    %44 = vector.shape_cast %43 : vector<1x128xi1> to vector<1x128xi1>
    %45 = vector.broadcast %44 : vector<1x128xi1> to vector<4x128xi1>
    %46 = vector.broadcast %cst_9 : f32 to vector<4x128xf32>
    %47 = arith.select %45, %0, %46 : vector<4x128xi1>, vector<4x128xf32>
    %cst_10 = arith.constant dense<0.000000e+00> : vector<4xf32>
    %48 = vector.multi_reduction <add>, %47, %cst_10 [1] : vector<4x128xf32> to vector<4xf32>
    %49 = vector.shape_cast %48 : vector<4xf32> to vector<4x1xf32>
    %cst_11 = arith.constant 3.125000e-02 : f32
    %50 = vector.broadcast %cst_11 : f32 to vector<4x1xf32>
    %51 = arith.mulf %49, %50 : vector<4x1xf32>
    %52 = vector.shape_cast %43 : vector<1x128xi1> to vector<1x128xi1>
    %53 = vector.broadcast %52 : vector<1x128xi1> to vector<4x128xi1>
    %54 = vector.shape_cast %51 : vector<4x1xf32> to vector<4x1xf32>
    %55 = vector.broadcast %54 : vector<4x1xf32> to vector<4x128xf32>
    %56 = arith.select %53, %55, %38 : vector<4x128xi1>, vector<4x128xf32>
    %c96_i32_12 = arith.constant 96 : i32
    %57 = vector.broadcast %c96_i32_12 : i32 to vector<1x128xi32>
    %58 = arith.cmpi sge, %1, %57 : vector<1x128xi32>
    %c128_i32 = arith.constant 128 : i32
    %59 = vector.broadcast %c128_i32 : i32 to vector<1x128xi32>
    %60 = arith.cmpi slt, %1, %59 : vector<1x128xi32>
    %61 = arith.andi %58, %60 : vector<1x128xi1>
    %cst_13 = arith.constant 0.000000e+00 : f32
    %62 = vector.shape_cast %61 : vector<1x128xi1> to vector<1x128xi1>
    %63 = vector.broadcast %62 : vector<1x128xi1> to vector<4x128xi1>
    %64 = vector.broadcast %cst_13 : f32 to vector<4x128xf32>
    %65 = arith.select %63, %0, %64 : vector<4x128xi1>, vector<4x128xf32>
    %cst_14 = arith.constant dense<0.000000e+00> : vector<4xf32>
    %66 = vector.multi_reduction <add>, %65, %cst_14 [1] : vector<4x128xf32> to vector<4xf32>
    %67 = vector.shape_cast %66 : vector<4xf32> to vector<4x1xf32>
    %cst_15 = arith.constant 3.125000e-02 : f32
    %68 = vector.broadcast %cst_15 : f32 to vector<4x1xf32>
    %69 = arith.mulf %67, %68 : vector<4x1xf32>
    %70 = vector.shape_cast %61 : vector<1x128xi1> to vector<1x128xi1>
    %71 = vector.broadcast %70 : vector<1x128xi1> to vector<4x128xi1>
    %72 = vector.shape_cast %69 : vector<4x1xf32> to vector<4x1xf32>
    %73 = vector.broadcast %72 : vector<4x1xf32> to vector<4x128xf32>
    %74 = arith.select %71, %73, %56 : vector<4x128xi1>, vector<4x128xf32>
    %75 = arith.subf %0, %74 : vector<4x128xf32>
    %76 = arith.mulf %75, %75 : vector<4x128xf32>
    %cst_16 = arith.constant 0.000000e+00 : f32
    %77 = vector.broadcast %cst_16 : f32 to vector<4x128xf32>
    %c0_i32_17 = arith.constant 0 : i32
    %78 = vector.broadcast %c0_i32_17 : i32 to vector<1x128xi32>
    %79 = arith.cmpi sge, %1, %78 : vector<1x128xi32>
    %c32_i32_18 = arith.constant 32 : i32
    %80 = vector.broadcast %c32_i32_18 : i32 to vector<1x128xi32>
    %81 = arith.cmpi slt, %1, %80 : vector<1x128xi32>
    %82 = arith.andi %79, %81 : vector<1x128xi1>
    %cst_19 = arith.constant 0.000000e+00 : f32
    %83 = vector.shape_cast %82 : vector<1x128xi1> to vector<1x128xi1>
    %84 = vector.broadcast %83 : vector<1x128xi1> to vector<4x128xi1>
    %85 = vector.broadcast %cst_19 : f32 to vector<4x128xf32>
    %86 = arith.select %84, %76, %85 : vector<4x128xi1>, vector<4x128xf32>
    %cst_20 = arith.constant dense<0.000000e+00> : vector<4xf32>
    %87 = vector.multi_reduction <add>, %86, %cst_20 [1] : vector<4x128xf32> to vector<4xf32>
    %88 = vector.shape_cast %87 : vector<4xf32> to vector<4x1xf32>
    %cst_21 = arith.constant 0.0322580636 : f32
    %89 = vector.broadcast %cst_21 : f32 to vector<4x1xf32>
    %90 = arith.mulf %88, %89 : vector<4x1xf32>
    %91 = vector.shape_cast %82 : vector<1x128xi1> to vector<1x128xi1>
    %92 = vector.broadcast %91 : vector<1x128xi1> to vector<4x128xi1>
    %93 = vector.shape_cast %90 : vector<4x1xf32> to vector<4x1xf32>
    %94 = vector.broadcast %93 : vector<4x1xf32> to vector<4x128xf32>
    %95 = arith.select %92, %94, %77 : vector<4x128xi1>, vector<4x128xf32>
    %c32_i32_22 = arith.constant 32 : i32
    %96 = vector.broadcast %c32_i32_22 : i32 to vector<1x128xi32>
    %97 = arith.cmpi sge, %1, %96 : vector<1x128xi32>
    %c64_i32_23 = arith.constant 64 : i32
    %98 = vector.broadcast %c64_i32_23 : i32 to vector<1x128xi32>
    %99 = arith.cmpi slt, %1, %98 : vector<1x128xi32>
    %100 = arith.andi %97, %99 : vector<1x128xi1>
    %cst_24 = arith.constant 0.000000e+00 : f32
    %101 = vector.shape_cast %100 : vector<1x128xi1> to vector<1x128xi1>
    %102 = vector.broadcast %101 : vector<1x128xi1> to vector<4x128xi1>
    %103 = vector.broadcast %cst_24 : f32 to vector<4x128xf32>
    %104 = arith.select %102, %76, %103 : vector<4x128xi1>, vector<4x128xf32>
    %cst_25 = arith.constant dense<0.000000e+00> : vector<4xf32>
    %105 = vector.multi_reduction <add>, %104, %cst_25 [1] : vector<4x128xf32> to vector<4xf32>
    %106 = vector.shape_cast %105 : vector<4xf32> to vector<4x1xf32>
    %cst_26 = arith.constant 0.0322580636 : f32
    %107 = vector.broadcast %cst_26 : f32 to vector<4x1xf32>
    %108 = arith.mulf %106, %107 : vector<4x1xf32>
    %109 = vector.shape_cast %100 : vector<1x128xi1> to vector<1x128xi1>
    %110 = vector.broadcast %109 : vector<1x128xi1> to vector<4x128xi1>
    %111 = vector.shape_cast %108 : vector<4x1xf32> to vector<4x1xf32>
    %112 = vector.broadcast %111 : vector<4x1xf32> to vector<4x128xf32>
    %113 = arith.select %110, %112, %95 : vector<4x128xi1>, vector<4x128xf32>
    %c64_i32_27 = arith.constant 64 : i32
    %114 = vector.broadcast %c64_i32_27 : i32 to vector<1x128xi32>
    %115 = arith.cmpi sge, %1, %114 : vector<1x128xi32>
    %c96_i32_28 = arith.constant 96 : i32
    %116 = vector.broadcast %c96_i32_28 : i32 to vector<1x128xi32>
    %117 = arith.cmpi slt, %1, %116 : vector<1x128xi32>
    %118 = arith.andi %115, %117 : vector<1x128xi1>
    %cst_29 = arith.constant 0.000000e+00 : f32
    %119 = vector.shape_cast %118 : vector<1x128xi1> to vector<1x128xi1>
    %120 = vector.broadcast %119 : vector<1x128xi1> to vector<4x128xi1>
    %121 = vector.broadcast %cst_29 : f32 to vector<4x128xf32>
    %122 = arith.select %120, %76, %121 : vector<4x128xi1>, vector<4x128xf32>
    %cst_30 = arith.constant dense<0.000000e+00> : vector<4xf32>
    %123 = vector.multi_reduction <add>, %122, %cst_30 [1] : vector<4x128xf32> to vector<4xf32>
    %124 = vector.shape_cast %123 : vector<4xf32> to vector<4x1xf32>
    %cst_31 = arith.constant 0.0322580636 : f32
    %125 = vector.broadcast %cst_31 : f32 to vector<4x1xf32>
    %126 = arith.mulf %124, %125 : vector<4x1xf32>
    %127 = vector.shape_cast %118 : vector<1x128xi1> to vector<1x128xi1>
    %128 = vector.broadcast %127 : vector<1x128xi1> to vector<4x128xi1>
    %129 = vector.shape_cast %126 : vector<4x1xf32> to vector<4x1xf32>
    %130 = vector.broadcast %129 : vector<4x1xf32> to vector<4x128xf32>
    %131 = arith.select %128, %130, %113 : vector<4x128xi1>, vector<4x128xf32>
    %c96_i32_32 = arith.constant 96 : i32
    %132 = vector.broadcast %c96_i32_32 : i32 to vector<1x128xi32>
    %133 = arith.cmpi sge, %1, %132 : vector<1x128xi32>
    %c128_i32_33 = arith.constant 128 : i32
    %134 = vector.broadcast %c128_i32_33 : i32 to vector<1x128xi32>
    %135 = arith.cmpi slt, %1, %134 : vector<1x128xi32>
    %136 = arith.andi %133, %135 : vector<1x128xi1>
    %cst_34 = arith.constant 0.000000e+00 : f32
    %137 = vector.shape_cast %136 : vector<1x128xi1> to vector<1x128xi1>
    %138 = vector.broadcast %137 : vector<1x128xi1> to vector<4x128xi1>
    %139 = vector.broadcast %cst_34 : f32 to vector<4x128xf32>
    %140 = arith.select %138, %76, %139 : vector<4x128xi1>, vector<4x128xf32>
    %cst_35 = arith.constant dense<0.000000e+00> : vector<4xf32>
    %141 = vector.multi_reduction <add>, %140, %cst_35 [1] : vector<4x128xf32> to vector<4xf32>
    %142 = vector.shape_cast %141 : vector<4xf32> to vector<4x1xf32>
    %cst_36 = arith.constant 0.0322580636 : f32
    %143 = vector.broadcast %cst_36 : f32 to vector<4x1xf32>
    %144 = arith.mulf %142, %143 : vector<4x1xf32>
    %145 = vector.shape_cast %136 : vector<1x128xi1> to vector<1x128xi1>
    %146 = vector.broadcast %145 : vector<1x128xi1> to vector<4x128xi1>
    %147 = vector.shape_cast %144 : vector<4x1xf32> to vector<4x1xf32>
    %148 = vector.broadcast %147 : vector<4x1xf32> to vector<4x128xf32>
    %149 = arith.select %146, %148, %131 : vector<4x128xi1>, vector<4x128xf32>
    %150 = math.sqrt %149 : vector<4x128xf32>
    %cst_37 = arith.constant 9.99999997E-7 : f32
    %151 = vector.broadcast %cst_37 : f32 to vector<4x128xf32>
    %152 = arith.addf %150, %151 : vector<4x128xf32>
    %153 = tpu.reciprocal %152 : vector<4x128xf32> -> vector<4x128xf32>
    %c0_38 = arith.constant 0 : index
    %c0_39 = arith.constant 0 : index
    %154 = vector.load %arg2[%c0_38, %c0_39] : memref<1x128xf32, #tpu.memory_space<vmem>>, vector<1x128xf32>
    %c0_40 = arith.constant 0 : index
    %c0_41 = arith.constant 0 : index
    %155 = vector.load %arg3[%c0_40, %c0_41] : memref<1x128xf32, #tpu.memory_space<vmem>>, vector<1x128xf32>
    %156 = arith.mulf %75, %153 : vector<4x128xf32>
    %157 = vector.broadcast %154 : vector<1x128xf32> to vector<4x128xf32>
    %158 = arith.mulf %156, %157 : vector<4x128xf32>
    %159 = vector.broadcast %155 : vector<1x128xf32> to vector<4x128xf32>
    %160 = arith.addf %158, %159 : vector<4x128xf32>
    %c0_42 = arith.constant 0 : index
    %c0_43 = arith.constant 0 : index
    %161 = vector.load %arg4[%c0_42, %c0_43] : memref<4x128xf32, #tpu.memory_space<vmem>>, vector<4x128xf32>
    tpu.vector_store %arg4[%c0_42, %c0_43], %160 {strides = array<i32>} : memref<4x128xf32, #tpu.memory_space<vmem>>, vector<4x128xf32>,
    return
  }
  func.func @transform_0(%arg0: i32) -> (i32, i32) {
    %c0_i32 = arith.constant 0 : i32
    %c0_i32_0 = arith.constant 0 : i32
    return %arg0, %c0_i32 : i32, i32
  }
  func.func @transform_1(%arg0: i32) -> (i32, i32) {
    %c0_i32 = arith.constant 0 : i32
    %c0_i32_0 = arith.constant 0 : i32
    %c0_i32_1 = arith.constant 0 : i32
    return %c0_i32, %c0_i32_0 : i32, i32
  }
  func.func @transform_2(%arg0: i32) -> (i32, i32) {
    %c0_i32 = arith.constant 0 : i32
    %c0_i32_0 = arith.constant 0 : i32
    %c0_i32_1 = arith.constant 0 : i32
    return %c0_i32, %c0_i32_0 : i32, i32
  }
  func.func @transform_3(%arg0: i32) -> (i32, i32) {
    %c0_i32 = arith.constant 0 : i32
    %c0_i32_0 = arith.constant 0 : i32
    return %arg0, %c0_i32 : i32, i32
  }
}

</mosaic_0001>

<bundles_post_ra>
// kernel: tpu_custom_call.1
= control target key start
LH: loop header
LB: loop body
LE: loop exit
PB: predicated region body
PF: predicated region fallthrough
CT: control target
= control target key end

     0   :  { %8 = vsyncpa [#allocation3], 0  ;;  %s291_s0 = inlined_call_operand.hbm [shape: f32[4,128], index: 0, kind: input, shape index: {}]   ;;  %s292_s1 = inlined_call_operand.vmem [shape: f32[1,128], index: 1, kind: input, shape index: {}]   ;;  %s293_s2 = inlined_call_operand.vmem [shape: f32[1,128], index: 2, kind: input, shape index: {}]   ;;  %s294_s3 = inlined_call_operand.hbm [shape: f32[4,128], index: 3, kind: output, shape index: {}]  }
   0x1   :  { %9 = vsyncpa [#allocation4], 0  ;;  %s199_s12 = smov [#allocation2]   ;;  %s151_s16 = scalar_lea.hbm %s291_s0, 64 }
   0x2   :  { %s16_s13 = sshll.u32 %s199_s12, 4  ;;  %p152_p0 = scmp.ne.s32.totalorder %s291_s0, %s151_s16  ;;  %s17_s13 = int_to_ptr.vmem [resolvable:$true] %s16_s13 }
   0x3   :  { %p155_p1 = scmp.lt.u32.totalorder %s151_s16, %s291_s0 }
   0x5   :  { %p157_p2 = pnand %p155_p1, %p152_p0 }
   0x7   :  { %160 = shalt.err (!%p157_p2)
}
   0x8   :  { %s161_s21 = scalar_lea.vmem %s17_s13, 64  ;;  %p166_p4 = scmp.lt.s32.totalorder %s17_s13, %s17_s13 }
   0x9   :  { %p162_p3 = scmp.ne.s32.totalorder %s17_s13, %s161_s21  ;;  %p167_p5 = scmp.lt.s32.totalorder %s161_s21, %s161_s21 }
   0xb   :  { %p168_p6 = por %p167_p5, %p166_p4 }
   0xd   :  { %p169_p7 = pnand %p168_p6, %p162_p3 }
   0xf   :  { %172 = shalt.err (!%p169_p7)
}
  0x10   :  { %19 = dma.hbm_to_vmem [thread:$0]  %s291_s0, 64, %s17_s13, [#allocation3]  }
  0x11   :  { %195 = dma.done.wait [#allocation3], 64  }
  0x12   :  { %196 = vsyncadd [#allocation3], 4294967232  ;;  %v28_v0 = vlaneseq  ;;  %vm36_vm7 = vcmask 1043456   ;;  %v27_v4 = vld [vmem:[#allocation2] sm:$0xf]  ;;  %s200_s27 = smov [#allocation5]  }
  0x13   :  { %v143_v54 = vld [vmem:[%s292_s1] ss:$0 sm:$0xff]  ;;  %s134_s28 = sshll.u32 %s200_s27, 4  ;;  %s135_s28 = int_to_ptr.vmem [resolvable:$true] %s134_s28 }
  0x14   :  { %v29_v1 = vand.u32 127, %v28_v0  ;;  %v144_v56 = vld [vmem:[%s293_s2] ss:$0 sm:$0xff]  ;;  %s173_s29 = scalar_lea.vmem %s135_s28, 64  ;;  %p178_p9 = scmp.lt.s32.totalorder %s135_s28, %s135_s28 }
  0x15   :  { %p174_p8 = scmp.ne.s32.totalorder %s135_s28, %s173_s29  ;;  %p179_p10 = scmp.lt.s32.totalorder %s173_s29, %s173_s29 }
  0x16   :  { %vm53_vm0 = vcmp.ge.s32.totalorder %v29_v1, 64  ;;  %vm54_vm1 = vcmp.lt.s32.totalorder %v29_v1, 96  ;;  %vm42_vm2 = vcmp.ge.s32.totalorder %v29_v1, 32  ;;  %vm31_vm3 = vcmp.lt.s32.totalorder %v29_v1, 32 }
  0x17   :  { %vm233_vm4 = vmand %vm53_vm0, %vm54_vm1  ;;  %vm43_vm5 = vcmp.lt.s32.totalorder %v29_v1, 64  ;;  %vm64_vm6 = vcmp.ge.s32.totalorder %v29_v1, 96  ;;  %v35_v5 = vsel %vm31_vm3, %v27_v4, 0.0  ;;  %p180_p11 = por %p179_p10, %p178_p9 }
  0x18   :  { %vm237_vm8 = vmand %vm42_vm2, %vm43_vm5  ;;  %v58_v6 = vsel %vm233_vm4, %v27_v4, 0.0  ;;  %v69_v8 = vsel %vm64_vm6, %v27_v4, 0.0  ;;  %v37_v9 = vsel %vm36_vm7, %v35_v5, 0.0 }
  0x19   :  { %v47_v7 = vsel %vm237_vm8, %v27_v4, 0.0  ;;  %v59_v10 = vsel %vm36_vm7, %v58_v6, 0.0  ;;  %38 = vadd.xlane.f32.xlu0 %v37_v9  ;;  %v70_v12 = vsel %vm36_vm7, %v69_v8, 0.0  ;;  %p181_p12 = pnand %p180_p11, %p174_p8 }
  0x1a   :  { %60 = vadd.xlane.f32.xlu1 %v59_v10  ;;  %v48_v11 = vsel %vm36_vm7, %v47_v7, 0.0 }
  0x1d   :  { %49 = vadd.xlane.f32.xlu0 %v48_v11 }
  0x1e   :  { %71 = vadd.xlane.f32.xlu1 %v70_v12 }
  0xa6   :  { %v39_v13 = vpop.xlane.xlu0 %38 }
  0xa7   :  { %v61_v14 = vpop.xlane.xlu1 %60  ;;  %v40_v15 = vmul.f32 0.03125, %v39_v13 }
  0xa8   :  { %v62_v21 = vmul.f32 0.03125, %v61_v14 }
  0xa9   :  { %v41_v20 = vsel %vm31_vm3, %v40_v15, 0.0 }
  0xaa   :  { %v50_v16 = vpop.xlane.xlu0 %49 }
  0xab   :  { %v72_v17 = vpop.xlane.xlu1 %71  ;;  %v51_v18 = vmul.f32 0.03125, %v50_v16 }
  0xac   :  { %v73_v19 = vmul.f32 0.03125, %v72_v17 }
  0xad   :  { %v52_v22 = vsel %vm237_vm8, %v51_v18, %v41_v20 }
  0xae   :  { %v63_v23 = vsel %vm233_vm4, %v62_v21, %v52_v22 }
  0xaf   :  { %v74_v24 = vsel %vm64_vm6, %v73_v19, %v63_v23 }
  0xb0   :  { %v75_v25 = vsub.f32 %v27_v4, %v74_v24 }
  0xb2   :  { %v76_v26 = vmul.f32 %v75_v25, %v75_v25 }
  0xb4   :  { %v83_v27 = vsel %vm237_vm8, %v76_v26, 0.0  ;;  %v77_v28 = vsel %vm31_vm3, %v76_v26, 0.0  ;;  %v95_v31 = vsel %vm64_vm6, %v76_v26, 0.0  ;;  %v89_v32 = vsel %vm233_vm4, %v76_v26, 0.0 }
  0xb5   :  { %v84_v29 = vsel %vm36_vm7, %v83_v27, 0.0  ;;  %v78_v30 = vsel %vm36_vm7, %v77_v28, 0.0  ;;  %v96_v33 = vsel %vm36_vm7, %v95_v31, 0.0  ;;  %v90_v34 = vsel %vm36_vm7, %v89_v32, 0.0 }
  0xb6   :  { %85 = vadd.xlane.f32.xlu1 %v84_v29  ;;  %79 = vadd.xlane.f32.xlu0 %v78_v30 }
  0xba   :  { %97 = vadd.xlane.f32.xlu1 %v96_v33  ;;  %91 = vadd.xlane.f32.xlu0 %v90_v34 }
 0x143   :  { %v86_v35 = vpop.xlane.xlu1 %85  ;;  %v80_v36 = vpop.xlane.xlu0 %79 }
 0x144   :  { %v81_v37 = vmul.f32 0.032258064, %v80_v36  ;;  %v87_v38 = vmul.f32 0.032258064, %v86_v35 }
 0x146   :  { %v82_v39 = vsel %vm31_vm3, %v81_v37, 0.0 }
 0x147   :  { %v98_v40 = vpop.xlane.xlu1 %97  ;;  %v92_v41 = vpop.xlane.xlu0 %91  ;;  %v88_v44 = vsel %vm237_vm8, %v87_v38, %v82_v39 }
 0x148   :  { %v99_v42 = vmul.f32 0.032258064, %v98_v40  ;;  %v93_v43 = vmul.f32 0.032258064, %v92_v41 }
 0x14a   :  { %v94_v45 = vsel %vm233_vm4, %v93_v43, %v88_v44 }
 0x14b   :  { %v100_v46 = vsel %vm64_vm6, %v99_v42, %v94_v45 }
 0x14c   :  { %147 = vrsqrt.f32 %v100_v46  ;;  %vm103_vm9 = vcmp.eq.f32.partialorder %v100_v46, inf  ;;  %v106_v49 = vand.u32 2147483648, %v100_v46  ;;  %vm105_vm10 = vcmp.eq.f32.partialorder %v100_v46, 0.0 }
 0x156   :  { %v148_v47 = vpop.eup %147 }
 0x157   :  { %v102_v48 = vmul.f32 %v148_v47, %v100_v46 }
 0x159   :  { %v104_v50 = vsel %vm103_vm9, %v100_v46, %v102_v48 }
 0x15a   :  { %v107_v51 = vsel %vm105_vm10, %v106_v49, %v104_v50 }
 0x15b   :  { %v108_v52 = vadd.f32 1e-06, %v107_v51 }
 0x15d   :  { %149 = vrcp.f32 %v108_v52 }
 0x167   :  { %v150_v53 = vpop.eup %149 }
 0x168   :  { %v112_v55 = vmul.f32 %v150_v53, %v75_v25 }
 0x16a   :  { %v119_v57 = vmul.f32 %v143_v54, %v112_v55 }
 0x16c   :  { %v126_v58 = vadd.f32 %v144_v56, %v119_v57 }
 0x16e   :  { %127 = vst [vmem:[#allocation5] sm:$0xf] %v126_v58 }
 0x16f   :  { %184 = shalt.err (!%p181_p12)
}
 0x170   :  { %s185_s4 = scalar_lea.hbm %s294_s3, 64 }
 0x171   :  { %p186_p13 = scmp.ne.s32.totalorder %s294_s3, %s185_s4  ;;  %p189_p0 = scmp.lt.u32.totalorder %s185_s4, %s294_s3 }
 0x173   :  { %p191_p1 = pnand %p189_p0, %p186_p13 }
 0x175   :  { %194 = shalt.err (!%p191_p1)
}
 0x176   :  { %137 = dma.vmem_to_hbm [thread:$0]  %s135_s28, 64, %s294_s3, [#allocation4]  }
 0x177   :  { %197 = dma.done.wait [#allocation4], 64  }
 0x178   :  { %198 = vsyncadd [#allocation4], 4294967232 }
 0x179   :  { %141 = vsyncpa [#allocation3], 1 }
 0x17a   :  { %142 = vsyncpa [#allocation4], 1 }

</bundles_post_ra>
